<compile_context>
chip_gen: v7x
topology: tpu7x:2x2x1
jax: 0.10.0
libtpu: 0.0.40
codegen_flags: <defaults>
</compile_context>

<pallas_src>
import functools

import jax
import jax.numpy as jnp
from jax.experimental import pallas as pl
from jax.experimental.pallas import tpu as pltpu


def _round_up(x, m):
    return ((x + m - 1) // m) * m


def mlp_kernel(x_ref, w1_ref, b1_ref, w2_ref, b2_ref, w3_ref, b3_ref, o_ref):
    # fc1: bf16 operands on the MXU, f32 accumulation; bias + ReLU in f32.
    h = jnp.dot(x_ref[...], w1_ref[...], preferred_element_type=jnp.float32)
    h = jnp.maximum(h + b1_ref[...], 0.0)

    # fc2 (re-cast activations to the matmul dtype only for the MXU operand).
    h = jnp.dot(h.astype(w2_ref.dtype), w2_ref[...],
                preferred_element_type=jnp.float32)
    h = jnp.maximum(h + b2_ref[...], 0.0)

    # fc3: output columns padded to a lane-dense width; padded bias = -1e30
    # so exp(padded logit) == 0 and the softmax over real columns is exact.
    logits = jnp.dot(h.astype(w3_ref.dtype), w3_ref[...],
                     preferred_element_type=jnp.float32)
    logits = logits + b3_ref[...]

    # Softmax over dim=1 (feature axis == last axis of the 2-D tensor), f32.
    m = jnp.max(logits, axis=-1, keepdims=True)
    e = jnp.exp(logits - m)
    denom = jnp.sum(e, axis=-1, keepdims=True)
    o_ref[...] = (e * pl.reciprocal(denom, approx=True)).astype(o_ref.dtype)


def mlp_forward(x, params, *, tile_m=256, matmul_dtype=jnp.bfloat16):
    """x: [batch, input_dim] f32. params: (in, out)-layout weights + biases."""
    w1, b1, w2, b2, w3, b3 = (params["w1"], params["b1"], params["w2"],
                              params["b2"], params["w3"], params["b3"])
    batch, input_dim = x.shape
    hidden_dim = w1.shape[1]
    out_dim = w3.shape[1]

    # --- lane-dense output width (multiple of 128) -------------------------
    out_pad = _round_up(out_dim, 128)

    # --- batch tiling -------------------------------------------------------
    tile_m = min(tile_m, _round_up(batch, 8))           # sublane-aligned tile
    padded_batch = _round_up(batch, tile_m)
    num_tiles = padded_batch // tile_m

    xp = x
    if padded_batch != batch:
        xp = jnp.pad(x, ((0, padded_batch - batch), (0, 0)))
    xp = xp.astype(matmul_dtype)

    # Weights in matmul dtype (bf16 by default: halves HBM/VMEM footprint and
    # feeds the MXU at native rate; on v7x this is what keeps resident weights
    # inside the 64 MiB VMEM for larger hidden sizes).
    w1c = w1.astype(matmul_dtype)
    w2c = w2.astype(matmul_dtype)
    w3p = jnp.pad(w3, ((0, 0), (0, out_pad - out_dim))).astype(matmul_dtype)

    # Biases stay f32 (elementwise path); padded fc3 bias -> -1e30.
    b1r = b1.reshape(1, -1).astype(jnp.float32)
    b2r = b2.reshape(1, -1).astype(jnp.float32)
    b3p = jnp.pad(b3.reshape(1, -1).astype(jnp.float32),
                  ((0, 0), (0, out_pad - out_dim)), constant_values=-1e30)

    def resident(a):  # weights/biases: same block for every batch tile
        return pl.BlockSpec(a.shape, lambda i: (0,) * a.ndim)

    def nbytes(a):
        return a.size * a.dtype.itemsize

    # Cost hint for XLA's scheduler around the custom call.
    flops = 2 * padded_batch * (input_dim * hidden_dim
                                + hidden_dim * hidden_dim
                                + hidden_dim * out_pad)
    bytes_accessed = (nbytes(xp) + nbytes(w1c) + nbytes(w2c) + nbytes(w3p)
                      + nbytes(b1r) + nbytes(b2r) + nbytes(b3p)
                      + padded_batch * out_pad * 4)
    cost = pl.CostEstimate(flops=flops,
                           transcendentals=padded_batch * out_pad,
                           bytes_accessed=bytes_accessed)

    # VMEM budget: resident weights + double-buffered x/out tiles + activations.
    weight_bytes = (nbytes(w1c) + nbytes(w2c) + nbytes(w3p)
                    + nbytes(b1r) + nbytes(b2r) + nbytes(b3p))
    tile_bytes = 2 * (tile_m * input_dim * xp.dtype.itemsize
                      + tile_m * out_pad * 4)
    act_bytes = 3 * tile_m * max(hidden_dim, out_pad) * 4
    needed = weight_bytes + tile_bytes + act_bytes
    vmem_limit = int(min(max(2 * needed, 32 * 2**20), 96 * 2**20))

    out_padded = pl.pallas_call(
        mlp_kernel,
        out_shape=jax.ShapeDtypeStruct((padded_batch, out_pad), jnp.float32),
        grid_spec=pltpu.PrefetchScalarGridSpec(
            num_scalar_prefetch=0,
            grid=(num_tiles,),
            in_specs=[
                pl.BlockSpec((tile_m, input_dim), lambda i: (i, 0)),  # x tile
                resident(w1c), resident(b1r),
                resident(w2c), resident(b2r),
                resident(w3p), resident(b3p),
            ],
            out_specs=pl.BlockSpec((tile_m, out_pad), lambda i: (i, 0)),
        ),
        compiler_params=pltpu.CompilerParams(
            dimension_semantics=("parallel",),
            vmem_limit_bytes=vmem_limit,
        ),
        cost_estimate=cost,
    )(xp, w1c, b1r, w2c, b2r, w3p, b3p)

    return out_padded[:batch, :out_dim]


def init_params(key, input_dim, hidden_dim, output_dim):
    """Deterministic init. Weights stored as (in_features, out_features)."""
    ks = jax.random.split(key, 6)

    def linear(kw, kb, fan_in, fan_out):
        # Mimic PyTorch Linear default: U(-1/sqrt(fan_in), 1/sqrt(fan_in))
        bound = 1.0 / (fan_in ** 0.5)
        w = jax.random.uniform(kw, (fan_in, fan_out), jnp.float32,
                               minval=-bound, maxval=bound)
        b = jax.random.uniform(kb, (fan_out,), jnp.float32,
                               minval=-bound, maxval=bound)
        return w, b

    w1, b1 = linear(ks[0], ks[1], input_dim, hidden_dim)
    w2, b2 = linear(ks[2], ks[3], hidden_dim, hidden_dim)
    w3, b3 = linear(ks[4], ks[5], hidden_dim, output_dim)
    return {"w1": w1, "b1": b1, "w2": w2, "b2": b2, "w3": w3, "b3": b3}


def mlp_reference(x, params):
    h = jnp.maximum(x @ params["w1"] + params["b1"], 0.0)
    h = jnp.maximum(h @ params["w2"] + params["b2"], 0.0)
    logits = h @ params["w3"] + params["b3"]
    return jax.nn.softmax(logits, axis=1)


if __name__ == "__main__":
    key = jax.random.PRNGKey(0)
    k_x, k_p, k_x2 = jax.random.split(key, 3)

    batch, input_dim, hidden_dim, output_dim = 8, 16, 32, 10
    x = jax.random.normal(k_x, (batch, input_dim), dtype=jnp.float32)
    params = init_params(k_p, input_dim, hidden_dim, output_dim)

    fwd = jax.jit(functools.partial(mlp_forward, tile_m=256))
    out = jax.block_until_ready(fwd(x, params))
    ref = mlp_reference(x, params)

    assert out.shape == (batch, output_dim)
    # bf16 matmul operands (f32 accumulate) -> loose tolerance vs f32 reference
    assert jnp.allclose(out, ref, atol=2e-2, rtol=2e-2), "mismatch vs reference"
    assert jnp.allclose(jnp.sum(out, axis=1), 1.0, atol=5e-3), \
        "softmax rows must sum to 1"

    # Exercise multi-tile grid + batch padding path.
    batch2 = 260
    x2 = jax.random.normal(k_x2, (batch2, input_dim), dtype=jnp.float32)
    fwd2 = jax.jit(functools.partial(mlp_forward, tile_m=128))
    out2 = jax.block_until_ready(fwd2(x2, params))
    ref2 = mlp_reference(x2, params)
    assert out2.shape == (batch2, output_dim)
    assert jnp.allclose(out2, ref2, atol=2e-2, rtol=2e-2), "multi-tile mismatch"
    assert jnp.allclose(jnp.sum(out2, axis=1), 1.0, atol=5e-3)

    print("KERNEL_OK")
</pallas_src>

<mosaic_0001>
module attributes {stable_mosaic.version = 11 : i64} {
  func.func @mlp_kernel(%arg0: i32, %arg1: memref<8x16xbf16, #tpu.memory_space<vmem>>, %arg2: memref<16x32xbf16, #tpu.memory_space<vmem>>, %arg3: memref<1x32xf32, #tpu.memory_space<vmem>>, %arg4: memref<32x32xbf16, #tpu.memory_space<vmem>>, %arg5: memref<1x32xf32, #tpu.memory_space<vmem>>, %arg6: memref<32x128xbf16, #tpu.memory_space<vmem>>, %arg7: memref<1x128xf32, #tpu.memory_space<vmem>>, %arg8: memref<8x128xf32, #tpu.memory_space<vmem>>) attributes {dimension_semantics = [#tpu.dimension_semantics<parallel>], iteration_bounds = array<i64: 1>, scalar_prefetch = 0 : i64, scratch_operands = 0 : i64, tpu.core_type = #tpu.core_type<tc>, window_params = [{transform_indices = @transform_0, window_bounds = array<i64: 8, 16>}, {pipeline_mode = #tpu.pipeline_mode<synchronous>, transform_indices = @transform_1, window_bounds = array<i64: 16, 32>}, {pipeline_mode = #tpu.pipeline_mode<synchronous>, transform_indices = @transform_2, window_bounds = array<i64: 1, 32>}, {pipeline_mode = #tpu.pipeline_mode<synchronous>, transform_indices = @transform_3, window_bounds = array<i64: 32, 32>}, {pipeline_mode = #tpu.pipeline_mode<synchronous>, transform_indices = @transform_4, window_bounds = array<i64: 1, 32>}, {pipeline_mode = #tpu.pipeline_mode<synchronous>, transform_indices = @transform_5, window_bounds = array<i64: 32, 128>}, {pipeline_mode = #tpu.pipeline_mode<synchronous>, transform_indices = @transform_6, window_bounds = array<i64: 1, 128>}, {transform_indices = @transform_7, window_bounds = array<i64: 8, 128>}]} {
    %c0 = arith.constant 0 : index
    %c0_0 = arith.constant 0 : index
    %0 = vector.load %arg1[%c0, %c0_0] : memref<8x16xbf16, #tpu.memory_space<vmem>>, vector<8x16xbf16>
    %c0_1 = arith.constant 0 : index
    %c0_2 = arith.constant 0 : index
    %1 = vector.load %arg2[%c0_1, %c0_2] : memref<16x32xbf16, #tpu.memory_space<vmem>>, vector<16x32xbf16>
    %cst = arith.constant dense<0.000000e+00> : vector<8x32xf32>
    %2 = tpu.matmul %0, %1, %cst {dimension_numbers = #tpu.dot_dimension_numbers<[1], [0], [0], [1], [0, 0, 1, 1], [], []>} : vector<8x16xbf16>, vector<16x32xbf16>, vector<8x32xf32> -> vector<8x32xf32>
    %c0_3 = arith.constant 0 : index
    %c0_4 = arith.constant 0 : index
    %3 = vector.load %arg3[%c0_3, %c0_4] : memref<1x32xf32, #tpu.memory_space<vmem>>, vector<1x32xf32>
    %4 = vector.broadcast %3 : vector<1x32xf32> to vector<8x32xf32>
    %5 = arith.addf %2, %4 : vector<8x32xf32>
    %cst_5 = arith.constant 0.000000e+00 : f32
    %6 = vector.broadcast %cst_5 : f32 to vector<8x32xf32>
    %7 = arith.maximumf %5, %6 : vector<8x32xf32>
    %8 = arith.truncf %7 : vector<8x32xf32> to vector<8x32xbf16>
    %c0_6 = arith.constant 0 : index
    %c0_7 = arith.constant 0 : index
    %9 = vector.load %arg4[%c0_6, %c0_7] : memref<32x32xbf16, #tpu.memory_space<vmem>>, vector<32x32xbf16>
    %cst_8 = arith.constant dense<0.000000e+00> : vector<8x32xf32>
    %10 = tpu.matmul %8, %9, %cst_8 {dimension_numbers = #tpu.dot_dimension_numbers<[1], [0], [0], [1], [0, 0, 1, 1], [], []>} : vector<8x32xbf16>, vector<32x32xbf16>, vector<8x32xf32> -> vector<8x32xf32>
    %c0_9 = arith.constant 0 : index
    %c0_10 = arith.constant 0 : index
    %11 = vector.load %arg5[%c0_9, %c0_10] : memref<1x32xf32, #tpu.memory_space<vmem>>, vector<1x32xf32>
    %12 = vector.broadcast %11 : vector<1x32xf32> to vector<8x32xf32>
    %13 = arith.addf %10, %12 : vector<8x32xf32>
    %cst_11 = arith.constant 0.000000e+00 : f32
    %14 = vector.broadcast %cst_11 : f32 to vector<8x32xf32>
    %15 = arith.maximumf %13, %14 : vector<8x32xf32>
    %16 = arith.truncf %15 : vector<8x32xf32> to vector<8x32xbf16>
    %c0_12 = arith.constant 0 : index
    %c0_13 = arith.constant 0 : index
    %17 = vector.load %arg6[%c0_12, %c0_13] : memref<32x128xbf16, #tpu.memory_space<vmem>>, vector<32x128xbf16>
    %cst_14 = arith.constant dense<0.000000e+00> : vector<8x128xf32>
    %18 = tpu.matmul %16, %17, %cst_14 {dimension_numbers = #tpu.dot_dimension_numbers<[1], [0], [0], [1], [0, 0, 1, 1], [], []>} : vector<8x32xbf16>, vector<32x128xbf16>, vector<8x128xf32> -> vector<8x128xf32>
    %c0_15 = arith.constant 0 : index
    %c0_16 = arith.constant 0 : index
    %19 = vector.load %arg7[%c0_15, %c0_16] : memref<1x128xf32, #tpu.memory_space<vmem>>, vector<1x128xf32>
    %20 = vector.broadcast %19 : vector<1x128xf32> to vector<8x128xf32>
    %21 = arith.addf %18, %20 : vector<8x128xf32>
    %cst_17 = arith.constant dense<0xFF800000> : vector<8xf32>
    %22 = vector.multi_reduction <maximumf>, %21, %cst_17 [1] : vector<8x128xf32> to vector<8xf32>
    %23 = vector.shape_cast %22 : vector<8xf32> to vector<8x1xf32>
    %24 = vector.broadcast %23 : vector<8x1xf32> to vector<8x128xf32>
    %25 = arith.subf %21, %24 : vector<8x128xf32>
    %26 = math.exp %25 : vector<8x128xf32>
    %cst_18 = arith.constant dense<0.000000e+00> : vector<8xf32>
    %27 = vector.multi_reduction <add>, %26, %cst_18 [1] : vector<8x128xf32> to vector<8xf32>
    %28 = vector.shape_cast %27 : vector<8xf32> to vector<8x1xf32>
    %29 = tpu.reciprocal %28 {approx = true} : vector<8x1xf32> -> vector<8x1xf32>
    %30 = vector.broadcast %29 : vector<8x1xf32> to vector<8x128xf32>
    %31 = arith.mulf %26, %30 : vector<8x128xf32>
    %c0_19 = arith.constant 0 : index
    %c0_20 = arith.constant 0 : index
    %32 = vector.load %arg8[%c0_19, %c0_20] : memref<8x128xf32, #tpu.memory_space<vmem>>, vector<8x128xf32>
    tpu.vector_store %arg8[%c0_19, %c0_20], %31 {strides = array<i32>} : memref<8x128xf32, #tpu.memory_space<vmem>>, vector<8x128xf32>,
    return
  }
  func.func @transform_0(%arg0: i32) -> (i32, i32) {
    %c0_i32 = arith.constant 0 : i32
    %c0_i32_0 = arith.constant 0 : i32
    return %arg0, %c0_i32 : i32, i32
  }
  func.func @transform_1(%arg0: i32) -> (i32, i32) {
    %c0_i32 = arith.constant 0 : i32
    %c0_i32_0 = arith.constant 0 : i32
    %c0_i32_1 = arith.constant 0 : i32
    return %c0_i32, %c0_i32_0 : i32, i32
  }
  func.func @transform_2(%arg0: i32) -> (i32, i32) {
    %c0_i32 = arith.constant 0 : i32
    %c0_i32_0 = arith.constant 0 : i32
    %c0_i32_1 = arith.constant 0 : i32
    return %c0_i32, %c0_i32_0 : i32, i32
  }
  func.func @transform_3(%arg0: i32) -> (i32, i32) {
    %c0_i32 = arith.constant 0 : i32
    %c0_i32_0 = arith.constant 0 : i32
    %c0_i32_1 = arith.constant 0 : i32
    return %c0_i32, %c0_i32_0 : i32, i32
  }
  func.func @transform_4(%arg0: i32) -> (i32, i32) {
    %c0_i32 = arith.constant 0 : i32
    %c0_i32_0 = arith.constant 0 : i32
    %c0_i32_1 = arith.constant 0 : i32
    return %c0_i32, %c0_i32_0 : i32, i32
  }
  func.func @transform_5(%arg0: i32) -> (i32, i32) {
    %c0_i32 = arith.constant 0 : i32
    %c0_i32_0 = arith.constant 0 : i32
    %c0_i32_1 = arith.constant 0 : i32
    return %c0_i32, %c0_i32_0 : i32, i32
  }
  func.func @transform_6(%arg0: i32) -> (i32, i32) {
    %c0_i32 = arith.constant 0 : i32
    %c0_i32_0 = arith.constant 0 : i32
    %c0_i32_1 = arith.constant 0 : i32
    return %c0_i32, %c0_i32_0 : i32, i32
  }
  func.func @transform_7(%arg0: i32) -> (i32, i32) {
    %c0_i32 = arith.constant 0 : i32
    %c0_i32_0 = arith.constant 0 : i32
    return %arg0, %c0_i32 : i32, i32
  }
}

</mosaic_0001>

<bundles_post_ra>
// kernel: mlp_forward.1
= control target key start
LH: loop header
LB: loop body
LE: loop exit
PB: predicated region body
PF: predicated region fallthrough
CT: control target
= control target key end

     0   :  { %v326_v1 = vmov 0.0   ;;  %vm44_vm0 = vcmask 130048   ;;  %vm327_vm1 = vmmov 0   ;;  %s408_s0 = inlined_call_operand.vmem [shape: bf16[8,16], index: 0, kind: input, shape index: {}]   ;;  %s409_s1 = inlined_call_operand.vmem [shape: bf16[16,32], index: 1, kind: input, shape index: {}]   ;;  %s410_s2 = inlined_call_operand.vmem [shape: f32[1,32], index: 2, kind: input, shape index: {}]   ;;  %s411_s3 = inlined_call_operand.vmem [shape: bf16[32,32], index: 3, kind: input, shape index: {}]   ;;  %s412_s4 = inlined_call_operand.vmem [shape: f32[1,32], index: 4, kind: input, shape index: {}]   ;;  %s413_s5 = inlined_call_operand.vmem [shape: bf16[32,128], index: 5, kind: input, shape index: {}]   ;;  %s414_s6 = inlined_call_operand.vmem [shape: f32[1,128], index: 6, kind: input, shape index: {}]   ;;  %s415_s7 = inlined_call_operand.hbm [shape: f32[8,128], index: 7, kind: output, shape index: {}]  }
   0x1   :  { %v293_v0 = vld [vmem:[%s409_s1] sm:$0xff]   ;;  %268 = vmatprep.subr.bf16.mxu0 %v326_v1  ;;  %274 = vmatprep.subr.bf16.mxu1 %v326_v1 }
   0x2   :  { %v28_v2 = vld [vmem:[%s408_s0] sm:$0xf]  ;;  %269 = vmatpush3.bf16.msra.mxu0 %v293_v0  ;;  %270 = vmatprep.mubr.msk.bf16.mxu0 %vm327_vm1, %v326_v1 }
   0x3   :  { %278 = vmatprep.mubr.msk.bf16.mxu1 %vm327_vm1, %v326_v1  ;;  %282 = vmatprep.subr.bf16.mxu0 %v326_v1 }
   0x4   :  { %12 = vsyncpa [#allocation3], 0  ;;  %v294_v3 = vld [vmem:[%s411_s3] sm:$0xff]   ;;  %v295_v4 = vld [vmem:[%s411_s3 + $0x8] sm:$0xff]   ;;  %vm113_vm2 = vcmask 261120  }
   0x5   :  { %271 = vmatmul.mubr.msk.bf16.vlgmr.msra.gmra.mrb[0].mxu0 %vm44_vm0, %v28_v2  ;;  %275 = vmatpush3.bf16.msra.mxu1 %v294_v3  ;;  %v296_v5 = vld [vmem:[%s413_s5] sm:$0xff]   ;;  %v297_v14 = vld [vmem:[%s413_s5 + $0x8] sm:$0xff]  }
   0x6   :  { %286 = vmatprep.mubr.msk.bf16.mxu0 %vm327_vm1, %v326_v1  ;;  %276 = vmatprep.subr.bf16.mxu1 %v326_v1  ;;  %v249_v6 = vld [vmem:[%s410_s2] ss:$0 sm:$0xff] }
   0x7   :  { %283 = vmatpush3.bf16.msra.mxu0 %v296_v5  ;;  %v252_v15 = vld [vmem:[%s412_s4] ss:$0 sm:$0xff]  ;;  %s328_s4 = smov [#allocation2]  }
   0x8   :  { %284 = vmatprep.subr.bf16.mxu0 %v326_v1  ;;  %v256_v23 = vld [vmem:[%s414_s6] ss:$0 sm:$0xff]  ;;  %s241_s5 = sshll.u32 %s328_s4, 4  ;;  %s242_s5 = int_to_ptr.vmem [resolvable:$true] %s241_s5 }
   0x9   :  { %277 = vmatpush3.bf16.msra.mxu1 %v295_v4  ;;  %s302_s6 = scalar_lea.vmem %s242_s5, 128  ;;  %p307_p1 = scmp.lt.s32.totalorder %s242_s5, %s242_s5 }
   0xa   :  { %p303_p0 = scmp.ne.s32.totalorder %s242_s5, %s302_s6  ;;  %p308_p2 = scmp.lt.s32.totalorder %s302_s6, %s302_s6 }
   0xb   :  { %285 = vmatpush3.bf16.msra.mxu0 %v297_v14 }
   0xc   :  { %p309_p3 = por %p308_p2, %p307_p1 }
   0xe   :  { %p310_p4 = pnand %p309_p3, %p303_p0 }
  0xd8   :  { %v82_v7 = vpop.f32.mrb[0].mxu0 }
  0xd9   :  { %v83_v8 = vadd.f32 %v249_v6, %v82_v7  ;;  %v272_v9 = vpop.f32.mrb[1].mxu0 }
  0xda   :  { %v85_v10 = vpop.f32.mrb[2].mxu0 }
  0xdb   :  { %v88_v11 = vmax.f32 %v83_v8, 0.0  ;;  %v273_v12 = vpop.f32.mrb[3].mxu0 }
  0xdd   :  { %v89_v13 = vpack.c.bf16 %v88_v11, %v88_v11 }
  0xdf   :  { %279 = vmatmul.mubr.msk.bf16.vlgmr.msra.gmra.mrb[0].mxu1 %vm113_vm2, %v89_v13 }
 0x1b2   :  { %v151_v16 = vpop.f32.mrb[0].mxu1 }
 0x1b3   :  { %v152_v17 = vadd.f32 %v252_v15, %v151_v16  ;;  %v280_v18 = vpop.f32.mrb[1].mxu1 }
 0x1b4   :  { %v154_v19 = vpop.f32.mrb[2].mxu1 }
 0x1b5   :  { %v157_v20 = vmax.f32 %v152_v17, 0.0  ;;  %v281_v21 = vpop.f32.mrb[3].mxu1 }
 0x1b7   :  { %v158_v22 = vpack.c.bf16 %v157_v20, %v157_v20 }
 0x1b9   :  { %287 = vmatmul.mubr.msk.bf16.vlgmr.msra.gmra.mrb[4].mxu0 %vm113_vm2, %v158_v22 }
 0x28c   :  { %v219_v24 = vpop.f32.mrb[4].mxu0 }
 0x28d   :  { %v220_v25 = vadd.f32 %v256_v23, %v219_v24  ;;  %v288_v26 = vpop.f32.mrb[5].mxu0 }
 0x28e   :  { %v222_v27 = vpop.f32.mrb[6].mxu0 }
 0x28f   :  { %225 = vmax.xlane.f32.xlu0 %v220_v25  ;;  %v289_v28 = vpop.f32.mrb[7].mxu0 }
 0x31c   :  { %v226_v29 = vpop.xlane.xlu0 %225 }
 0x31d   :  { %v227_v30 = vsub.f32 %v220_v25, %v226_v29 }
 0x31f   :  { %v228_v31 = vmul.f32 1.442695, %v227_v30 }
 0x321   :  { %298 = vpow2.f32 %v228_v31 }
 0x32b   :  { %v299_v32 = vpop.eup %298 }
 0x32c   :  { %230 = vadd.xlane.f32.xlu0 %v299_v32 }
 0x3b9   :  { %v231_v33 = vpop.xlane.xlu0 %230 }
 0x3ba   :  { %300 = vrcp.f32 %v231_v33 }
 0x3c4   :  { %v301_v34 = vpop.eup %300 }
 0x3c5   :  { %v233_v35 = vmul.f32 %v301_v34, %v299_v32 }
 0x3c7   :  { %234 = vst [vmem:[#allocation2] sm:$0xff] %v233_v35 }
 0x3c8   :  { %313 = shalt.err (!%p310_p4)
}
 0x3c9   :  { %s314_s17 = scalar_lea.hbm %s415_s7, 128 }
 0x3ca   :  { %p315_p5 = scmp.ne.s32.totalorder %s415_s7, %s314_s17  ;;  %p318_p6 = scmp.lt.u32.totalorder %s314_s17, %s415_s7 }
 0x3cc   :  { %p320_p7 = pnand %p318_p6, %p315_p5 }
 0x3ce   :  { %323 = shalt.err (!%p320_p7)
}
 0x3cf   :  { %244 = dma.vmem_to_hbm [thread:$0]  %s242_s5, 128, %s415_s7, [#allocation3]  }
 0x3d0   :  { %324 = dma.done.wait [#allocation3], 128  }
 0x3d1   :  { %325 = vsyncadd [#allocation3], 4294967168 }
 0x3d2   :  { %248 = vsyncpa [#allocation3], 1 }

</bundles_post_ra>
